<compile_context>
chip_gen: v7x
topology: tpu7x:2x2x1
jax: 0.10.0
libtpu: 0.0.40
codegen_flags: <defaults>
</compile_context>

<pallas_src>
import math

import jax
import jax.numpy as jnp
from jax.experimental import pallas as pl
from jax.experimental.pallas import tpu as pltpu


def fused_conv_bn_relu_kernel(p_ref, w_ref, scale_ref, bias_ref, o_ref):
    """One grid step: (Cout, K) x (K, TM) matmul + folded-BN affine + ReLU.

    p_ref    : (1, K, TM)    bf16 im2col patches, K = 9 * Cin_total
    w_ref    : (Cout, K)     bf16 fused block-diagonal conv weight
    scale_ref: (Cout, 1)     f32 folded BN scale  (gamma / sqrt(var + eps))
    bias_ref : (Cout, 1)     f32 folded BN bias   (beta + (conv_b - mean)*scale)
    o_ref    : (1, Cout, TM) f32 output tile; lane axis = flattened H*W
    """
    acc = jnp.dot(w_ref[...], p_ref[0], preferred_element_type=jnp.float32)
    acc = acc * scale_ref[...] + bias_ref[...]
    o_ref[0] = jnp.maximum(acc, 0.0)


def _pick_m_tile(hw, max_tile=2048):
    """Largest tile of the flattened spatial dim (prefers multiples of 128)."""
    if hw <= max_tile:
        return hw
    for t in range(max_tile, 127, -1):
        if hw % t == 0 and t % 128 == 0:
            return t
    for t in range(max_tile, 0, -1):
        if hw % t == 0:
            return t
    return hw


def rgb_hsi_stem(x_nchw, params):
    """Forward of RGBHSIStem.  Input / output in PyTorch NCHW convention."""
    N, Cin, H, W = x_nchw.shape
    Cout = params["scale2d"].shape[0]
    HW = H * W
    K = 9 * Cin

    # im2col in the wrapper (transposed layout: contraction dim on sublanes,
    # flattened spatial dim on lanes).
    # TODO(synk): for large resolutions, tile H with an in-kernel 2-row halo
    #             instead of materializing the padded + im2col tensor in HBM.
    xp = jnp.pad(x_nchw, ((0, 0), (0, 0), (1, 1), (1, 1)))
    taps = [xp[:, :, dy:dy + H, dx:dx + W].reshape(N, Cin, HW)
            for dy in range(3) for dx in range(3)]
    patches = jnp.concatenate(taps, axis=1).astype(jnp.bfloat16)   # (N, K, HW)

    tm = _pick_m_tile(HW)
    grid = (N, HW // tm)

    out = pl.pallas_call(
        fused_conv_bn_relu_kernel,
        out_shape=jax.ShapeDtypeStruct((N, Cout, HW), jnp.float32),
        grid=grid,
        in_specs=[
            pl.BlockSpec((1, K, tm), lambda n, m: (n, 0, m)),
            pl.BlockSpec((Cout, K), lambda n, m: (0, 0)),
            pl.BlockSpec((Cout, 1), lambda n, m: (0, 0)),
            pl.BlockSpec((Cout, 1), lambda n, m: (0, 0)),
        ],
        out_specs=pl.BlockSpec((1, Cout, tm), lambda n, m: (n, 0, m)),
        compiler_params=pltpu.CompilerParams(
            dimension_semantics=("parallel", "parallel")),
    )(patches, params["w_fused"], params["scale2d"], params["bias2d"])

    return out.reshape(N, Cout, H, W)        # already NCHW, no transpose needed


def init_stem_params(key, in_channels, out_channels, eps=1e-5):
    """Deterministic init mirroring nn.Conv2d + nn.BatchNorm2d defaults,
    with both branches folded into one block-diagonal weight."""
    rgb_c = 3
    hsi_c = in_channels - 3
    half = out_channels // 2
    k_rw, k_rb, k_hw, k_hb = jax.random.split(key, 4)

    def conv_init(kw, kb, cin, cout):
        bound = 1.0 / math.sqrt(cin * 9)
        w = jax.random.uniform(kw, (cout, cin, 3, 3), jnp.float32, -bound, bound)
        b = jax.random.uniform(kb, (cout,), jnp.float32, -bound, bound)
        return w, b

    w_rgb, b_rgb = conv_init(k_rw, k_rb, rgb_c, half)
    w_hsi, b_hsi = conv_init(k_hw, k_hb, hsi_c, half)

    # BatchNorm2d defaults (eval mode): gamma=1, beta=0, mean=0, var=1.
    # TODO(synk): training-mode batch statistics are not implemented; BN is
    #             folded as an eval-mode per-channel affine.
    gamma = jnp.ones((out_channels,), jnp.float32)
    beta = jnp.zeros((out_channels,), jnp.float32)
    run_mean = jnp.zeros((out_channels,), jnp.float32)
    run_var = jnp.ones((out_channels,), jnp.float32)

    conv_b = jnp.concatenate([b_rgb, b_hsi])
    scale = gamma / jnp.sqrt(run_var + eps)
    bias = beta + (conv_b - run_mean) * scale

    # Fused block-diagonal weight, layout (Cout, dy, dx, c) -> (Cout, 9*Cin):
    #   contraction index = (dy*3 + dx) * Cin + c   (matches the im2col order).
    w_full = jnp.zeros((out_channels, 3, 3, in_channels), jnp.float32)
    w_full = w_full.at[:half, :, :, :rgb_c].set(jnp.transpose(w_rgb, (0, 2, 3, 1)))
    w_full = w_full.at[half:, :, :, rgb_c:].set(jnp.transpose(w_hsi, (0, 2, 3, 1)))
    w_fused = w_full.reshape(out_channels, 9 * in_channels).astype(jnp.bfloat16)

    return dict(
        w_fused=w_fused,
        scale2d=scale[:, None],
        bias2d=bias[:, None],
        # f32 torch-layout copies for the pure-JAX reference
        w_rgb=w_rgb, b_rgb=b_rgb, w_hsi=w_hsi, b_hsi=b_hsi,
    )


def reference_stem(x_nchw, params, eps=1e-5):
    """Pure-JAX reference (bf16-rounded inputs/weights, f32 math)."""
    xb = x_nchw.astype(jnp.bfloat16).astype(jnp.float32)

    def branch(x, w, b):
        wb = w.astype(jnp.bfloat16).astype(jnp.float32)
        y = jax.lax.conv_general_dilated(
            x, wb, window_strides=(1, 1), padding="SAME",
            dimension_numbers=("NCHW", "OIHW", "NCHW"))
        y = y + b[None, :, None, None]
        y = y / jnp.sqrt(1.0 + eps)      # BN eval: mean=0, var=1, gamma=1, beta=0
        return jnp.maximum(y, 0.0)

    rgb = branch(xb[:, :3], params["w_rgb"], params["b_rgb"])
    hsi = branch(xb[:, 3:], params["w_hsi"], params["b_hsi"])
    return jnp.concatenate([rgb, hsi], axis=1)


if __name__ == "__main__":
    key = jax.random.PRNGKey(0)
    k_x, k_p = jax.random.split(key)

    in_channels = 7            # 3 RGB + 4 HSI
    out_channels = 32
    N, H, W = 2, 16, 16

    x = jax.random.normal(k_x, (N, in_channels, H, W), jnp.float32)
    params = init_stem_params(k_p, in_channels, out_channels)

    out = jax.block_until_ready(rgb_hsi_stem(x, params))
    assert out.shape == (N, out_channels, H, W), out.shape

    ref = reference_stem(x, params)
    max_err = float(jnp.max(jnp.abs(out - ref)))
    assert jnp.allclose(out, ref, atol=2e-3, rtol=2e-3), max_err

    print("KERNEL_OK")
</pallas_src>

<mosaic_0001>
module attributes {stable_mosaic.version = 11 : i64} {
  func.func @fused_conv_bn_relu_kernel(%arg0: i32, %arg1: i32, %arg2: memref<1x63x256xbf16, #tpu.memory_space<vmem>>, %arg3: memref<32x63xbf16, #tpu.memory_space<vmem>>, %arg4: memref<32x1xf32, #tpu.memory_space<vmem>>, %arg5: memref<32x1xf32, #tpu.memory_space<vmem>>, %arg6: memref<1x32x256xf32, #tpu.memory_space<vmem>>) attributes {dimension_semantics = [#tpu.dimension_semantics<parallel>, #tpu.dimension_semantics<parallel>], iteration_bounds = array<i64: 2, 1>, scalar_prefetch = 0 : i64, scratch_operands = 0 : i64, tpu.core_type = #tpu.core_type<tc>, window_params = [{transform_indices = @transform_0, window_bounds = array<i64: 1, 63, 256>}, {pipeline_mode = #tpu.pipeline_mode<synchronous>, transform_indices = @transform_1, window_bounds = array<i64: 32, 63>}, {pipeline_mode = #tpu.pipeline_mode<synchronous>, transform_indices = @transform_2, window_bounds = array<i64: 32, 1>}, {pipeline_mode = #tpu.pipeline_mode<synchronous>, transform_indices = @transform_3, window_bounds = array<i64: 32, 1>}, {transform_indices = @transform_4, window_bounds = array<i64: 1, 32, 256>}]} {
    %c0 = arith.constant 0 : index
    %c0_0 = arith.constant 0 : index
    %0 = vector.load %arg3[%c0, %c0_0] : memref<32x63xbf16, #tpu.memory_space<vmem>>, vector<32x63xbf16>
    %c0_1 = arith.constant 0 : index
    %c0_2 = arith.constant 0 : index
    %c0_3 = arith.constant 0 : index
    %1 = vector.load %arg2[%c0_1, %c0_2, %c0_3] : memref<1x63x256xbf16, #tpu.memory_space<vmem>>, vector<1x63x256xbf16>
    %2 = vector.shape_cast %1 : vector<1x63x256xbf16> to vector<63x256xbf16>
    %cst = arith.constant dense<0.000000e+00> : vector<32x256xf32>
    %3 = tpu.matmul %0, %2, %cst {dimension_numbers = #tpu.dot_dimension_numbers<[1], [0], [0], [1], [0, 0, 1, 1], [], []>} : vector<32x63xbf16>, vector<63x256xbf16>, vector<32x256xf32> -> vector<32x256xf32>
    %c0_4 = arith.constant 0 : index
    %c0_5 = arith.constant 0 : index
    %4 = vector.load %arg4[%c0_4, %c0_5] : memref<32x1xf32, #tpu.memory_space<vmem>>, vector<32x1xf32>
    %5 = vector.broadcast %4 : vector<32x1xf32> to vector<32x256xf32>
    %6 = arith.mulf %3, %5 : vector<32x256xf32>
    %c0_6 = arith.constant 0 : index
    %c0_7 = arith.constant 0 : index
    %7 = vector.load %arg5[%c0_6, %c0_7] : memref<32x1xf32, #tpu.memory_space<vmem>>, vector<32x1xf32>
    %8 = vector.broadcast %7 : vector<32x1xf32> to vector<32x256xf32>
    %9 = arith.addf %6, %8 : vector<32x256xf32>
    %cst_8 = arith.constant 0.000000e+00 : f32
    %10 = vector.broadcast %cst_8 : f32 to vector<32x256xf32>
    %11 = arith.maximumf %9, %10 : vector<32x256xf32>
    %c0_9 = arith.constant 0 : index
    %c0_10 = arith.constant 0 : index
    %c0_11 = arith.constant 0 : index
    %12 = vector.load %arg6[%c0_9, %c0_10, %c0_11] : memref<1x32x256xf32, #tpu.memory_space<vmem>>, vector<1x32x256xf32>
    %13 = vector.shape_cast %12 : vector<1x32x256xf32> to vector<32x256xf32>
    %14 = vector.shape_cast %11 : vector<32x256xf32> to vector<1x32x256xf32>
    tpu.vector_store %arg6[%c0_9, %c0_10, %c0_11], %14 {strides = array<i32>} : memref<1x32x256xf32, #tpu.memory_space<vmem>>, vector<1x32x256xf32>,
    return
  }
  func.func @transform_0(%arg0: i32, %arg1: i32) -> (i32, i32, i32) {
    %c0_i32 = arith.constant 0 : i32
    %c0_i32_0 = arith.constant 0 : i32
    return %arg0, %c0_i32, %arg1 : i32, i32, i32
  }
  func.func @transform_1(%arg0: i32, %arg1: i32) -> (i32, i32) {
    %c0_i32 = arith.constant 0 : i32
    %c0_i32_0 = arith.constant 0 : i32
    %c0_i32_1 = arith.constant 0 : i32
    return %c0_i32, %c0_i32_0 : i32, i32
  }
  func.func @transform_2(%arg0: i32, %arg1: i32) -> (i32, i32) {
    %c0_i32 = arith.constant 0 : i32
    %c0_i32_0 = arith.constant 0 : i32
    %c0_i32_1 = arith.constant 0 : i32
    return %c0_i32, %c0_i32_0 : i32, i32
  }
  func.func @transform_3(%arg0: i32, %arg1: i32) -> (i32, i32) {
    %c0_i32 = arith.constant 0 : i32
    %c0_i32_0 = arith.constant 0 : i32
    %c0_i32_1 = arith.constant 0 : i32
    return %c0_i32, %c0_i32_0 : i32, i32
  }
  func.func @transform_4(%arg0: i32, %arg1: i32) -> (i32, i32, i32) {
    %c0_i32 = arith.constant 0 : i32
    %c0_i32_0 = arith.constant 0 : i32
    return %arg0, %c0_i32, %arg1 : i32, i32, i32
  }
}

</mosaic_0001>

<bundles_post_ra>
// kernel: tpu_custom_call.1
= control target key start
LH: loop header
LB: loop body
LE: loop exit
PB: predicated region body
PF: predicated region fallthrough
CT: control target
= control target key end

     0   :  { %9 = vsyncpa [#allocation3], 0  ;;  %s902_s0 = inlined_call_operand.vmem [shape: bf16[2,63,256], index: 0, kind: input, shape index: {}]   ;;  %s903_s1 = inlined_call_operand.vmem [shape: bf16[32,63], index: 1, kind: input, shape index: {}]   ;;  %s904_s2 = inlined_call_operand.vmem [shape: f32[32,1], index: 2, kind: input, shape index: {}]   ;;  %s905_s3 = inlined_call_operand.vmem [shape: f32[32,1], index: 3, kind: input, shape index: {}]   ;;  %s906_s4 = inlined_call_operand.hbm [shape: f32[2,32,256], index: 4, kind: output, shape index: {}]  }
   0x1   :  { %11 = vsyncpa [#allocation3 + $0x1], 0  ;;  %s753_s15 = smov 0   ;;  %s755_s16 = smov 0  }
   0x2   :  { %s757_s17 = smov 0   ;;  %s759_s18 = smov 0  }
   0x3   :  { %s761_s19 = smov 0   ;;  %s763_s20 = smov 0  }
   0x4 LB: > { %s533_s21 = sadd.s32 4294967295, %s721_s20   ;;  %s534_s22 = sadd.s32 4294967294, %s721_s20   ;;  %s721_s20 = sphi %s763_s20, %s17_s20   ;;  %s717_s19 = sphi %s761_s19, %s913_s19   ;;  %s713_s18 = sphi %s759_s18, %s912_s18   ;;  %s709_s17 = sphi %s757_s17, %s911_s17   ;;  %s705_s16 = sphi %s755_s16, %s910_s16   ;;  %s701_s15 = sphi %s753_s15, %s909_s15  }
   0x5   : > { %s29_s23 = sadd.s32 1, %s717_s19  ;;  %s129_s24 = sadd.s32 1, %s709_s17 }
   0x6   : > { %p31_p0 = scmp.ge.s32.totalorder %s29_s23, 2  ;;  %p139_p1 = scmp.ne.s32.totalorder %s709_s17, %s705_s16 }
   0x7   : > { %p140_p2 = scmp.eq.s32.totalorder %s533_s21, 1  ;;  %p145_p3 = scmp.ne.s32.totalorder %s705_s16, %s701_s15 }
   0x8   : > { %s915_s23 = smov (%p31_p0, %s29_s23), 0  ;;  %p146_p5 = scmp.eq.s32.totalorder %s534_s22, 1 }
   0x9   : > { %p793_p4 = por %p140_p2, %p139_p1  ;;  %s124_s26 = ssub.s32 %s717_s19, %s915_s23 }
   0xa   : > { %p537_p6 = scmp.ge.s32.totalorder %s721_s20, 1  ;;  %p127_p7 = scmp.eq.s32.totalorder %s124_s26, 0 }
   0xb   : > { %p800_p8 = por %p146_p5, %p145_p3  ;;  %p186_p9 = scmp.lt.s32.totalorder %s721_s20, 3 }
   0xc   : > { %s806_s28 = scalar_select %p127_p7, %s709_s17, %s129_s24  }
   0xd   : > { %p187_p10 = pnand %p537_p6, %p186_p9 }
   0xe   : > { %p217_p11 = scmp.lt.s32.totalorder (!%p187_p10), %s713_s18, 1  ;;  %v723_v0 = vmov (!%p187_p10), 0   ;;  %v360_v1 = vld [vmem:[%s904_s2 + $0x10] sm:$0xff] (!%p187_p10)  ;;  %v358_v2 = vld [vmem:[%s904_s2] sm:$0xff] (!%p187_p10)  ;;  %vm295_vm0 = vcmask (!%p187_p10), 1046528   ;;  %v361_v4 = vld [vmem:[%s904_s2 + $0x18] sm:$0xff] (!%p187_p10) }
   0xf   : > { %190 = sbr.rel (%p187_p10) target bundleno = 279 (0x117), region = 36  ;;  %337 = vmatprep.mubr.bf16.mxu0 (!%p187_p10), %v723_v0  ;;  %347 = vmatprep.mubr.bf16.mxu1 (!%p187_p10), %v723_v0  ;;  %vm296_vm1 = vcmask (!%p187_p10), 1047552   ;;  %v724_v7 = vmov (!%p187_p10), 65535   ;;  %v359_v9 = vld [vmem:[%s904_s2 + $0x8] sm:$0xff] (!%p187_p10)  ;;  %v390_v15 = vld [vmem:[%s905_s3] sm:$0xff] (!%p187_p10)  ;;  %v393_v19 = vld [vmem:[%s905_s3 + $0x18] sm:$0xff] (!%p187_p10) }
  0x10   : > { %628 = vset.pattern.permute.xlu1 (!%p187_p10), %v723_v0  ;;  %627 = vset.pattern.permute.xlu0 (!%p187_p10), %v723_v0  ;;  %v297_v8 = vsel (!%p187_p10), %vm295_vm0, 4294967295, %v724_v7  ;;  %v391_v14 = vld [vmem:[%s905_s3 + $0x8] sm:$0xff] (!%p187_p10)  ;;  %v392_v20 = vld [vmem:[%s905_s3 + $0x10] sm:$0xff] (!%p187_p10)  ;;  %v641_v22 = vld [vmem:[%s903_s1] sm:$0xff] (!%p187_p10)   ;;  %vm288_vm2 = vcmask (!%p187_p10), 515072   ;;  %s213_s12 = sand.u32 (!%p187_p10), 1, %s705_s16  }
  0x11   : > { %374 = vperm.xlu1 (!%p187_p10), %628, %v360_v1   ;;  %364 = vperm.xlu0 (!%p187_p10), %627, %v358_v2   ;;  %v298_v13 = vsel (!%p187_p10), %vm296_vm1, %v297_v8, 0  ;;  %v642_v23 = vld [vmem:[%s903_s1 + $0x8] sm:$0xff] (!%p187_p10)   ;;  %s538_s13 = sshll.u32 (!%p187_p10), %s213_s12, 6  ;;  %s559_s14 = sshll.u32 (!%p187_p10), %s713_s18, 10 }
  0x12   : > { %s215_s21 = scalar_lea.vmem (!%p187_p10), [#allocation2], %s538_s13  ;;  %s725_s5 = smov (!%p187_p10), [#allocation2]  }
  0x13   : > { %s454_s22 = sshll.u32 (!%p187_p10), %s215_s21, 4  ;;  %s647_s6 = sshll.u32 (!%p187_p10), %s725_s5, 4  ;;  %s852_s22 = int_to_ptr.vmem [resolvable:$true] %s454_s22  ;;  %s648_s6 = int_to_ptr.vmem [resolvable:$false] %s647_s6 }
  0x14   : > { %s643_s30 = scalar_lea.vmem (!%p187_p10), %s852_s22, 1024  ;;  %s649_s7 = scalar_lea.vmem (!%p187_p10), %s648_s6, 2048 }
  0x15   : > { %379 = vperm.xlu1 (!%p187_p10), %628, %v361_v4   ;;  %369 = vperm.xlu0 (!%p187_p10), %627, %v359_v9   ;;  %p644_p12 = scmp.ne.s32.totalorder (!%p187_p10), %s852_s22, %s643_s30  ;;  %p650_p1 = scmp.lt.s32.totalorder (!%p187_p10), %s852_s22, %s648_s6 }
  0x16   : > { %s218_s29 = scalar_select %p217_p11, %s713_s18, 1 }
  0x17   : > { %s850_s18 = scalar_lea.hbm %s906_s4, %s559_s14  ;;  %p645_p13 = pnand %p644_p12, %p793_p4 }
  0x18   : > { %s558_s8 = sshll.u32 %s218_s29, 6  ;;  %s856_s29 = scalar_lea.sflag [#allocation3], %s213_s12 }
  0x19   : > { %s224_s11 = scalar_lea.vmem %s902_s0, %s558_s8  ;;  %401 = vperm.xlu1 %628, %v391_v14   ;;  %396 = vperm.xlu0 %627, %v390_v15   ;;  %p646_p0 = pneg %p645_p13 }
  0x1a   : > { %v629_v3 = vld [vmem:[%s224_s11 + $0x4] ss:$8 sps:$4 sm:$0xff]   ;;  %v631_v5 = vld [vmem:[%s224_s11] ss:$8 sps:$4 sm:$0xff]   ;;  %v632_v6 = vld [vmem:[%s224_s11 + $0x14] ss:$8 sps:$4 sm:$0xff]   ;;  %p651_p2 = scmp.lt.s32.totalorder %s649_s7, %s643_s30 }
  0x1b   : > { %305 = vmatprep.subr.bf16.mxu0 %v629_v3  ;;  %560 = vmatprep.subr.bf16.mxu1 %v629_v3  ;;  %v634_v10 = vld [vmem:[%s224_s11 + $0x10] ss:$8 sps:$4 sm:$0xff]   ;;  %v635_v11 = vld [vmem:[%s224_s11 + $0x24] ss:$8 sps:$4 sm:$0xff]   ;;  %v638_v12 = vld [vmem:[%s224_s11 + $0x34] ss:$8 sps:$4 sm:$0xff]  }
  0x1c   : > { %306 = vmatpush1.bf16.msra.mxu0 %v631_v5  ;;  %564 = vmatpush1.bf16.msra.mxu1 %v631_v5  ;;  %v637_v16 = vld [vmem:[%s224_s11 + $0x20] ss:$8 sps:$4 sm:$0xff]   ;;  %v640_v17 = vld [vmem:[%s224_s11 + $0x30] ss:$8 sps:$4 sm:$0xff]   ;;  %v303_v18 = vand.u32 %v638_v12, %v298_v13  ;;  %p652_p3 = por %p651_p2, %p650_p1 }
  0x1d   : > { %307 = vmatprep.subr.bf16.mxu0 %v632_v6  ;;  %561 = vmatprep.subr.bf16.mxu1 %v632_v6  ;;  %v300_v21 = vand.u32 %v640_v17, %v298_v13 }
  0x1e   : > { %411 = vperm.xlu1 %628, %v393_v19   ;;  %406 = vperm.xlu0 %627, %v392_v20   ;;  %p653_p5 = pnand %p652_p3, %p646_p0 }
  0x20   : > { %308 = vmatpush1.bf16.msra.mxu0 %v634_v10  ;;  %565 = vmatpush1.bf16.msra.mxu1 %v634_v10 }
  0x21   : > { %309 = vmatprep.subr.bf16.mxu0 %v635_v11  ;;  %562 = vmatprep.subr.bf16.mxu1 %v635_v11 }
  0x24   : > { %310 = vmatpush1.bf16.msra.mxu0 %v637_v16  ;;  %566 = vmatpush1.bf16.msra.mxu1 %v637_v16 }
  0x25   : > { %311 = vmatprep.subr.bf16.mxu0 %v303_v18  ;;  %563 = vmatprep.subr.bf16.mxu1 %v303_v18 }
  0x28   : > { %312 = vmatpush1.bf16.msra.mxu0 %v300_v21  ;;  %567 = vmatpush1.bf16.msra.mxu1 %v300_v21 }
  0x2b   : > { %551 = vmatmul.mubr.msk.bf16.vlgmr.msra.gmra.mrb[0].mxu0 %vm288_vm2, %v641_v22  ;;  %552 = vmatmul.mubr.msk.bf16.vlgmr.msra.gmra.mrb[0].mxu1 %vm288_vm2, %v642_v23 }
  0x90   : > { %v365_v24 = vpop.permute.xlu0 %364  ;;  %v375_v25 = vpop.permute.xlu1 %374 }
  0x94   : > { %v370_v26 = vpop.permute.xlu0 %369  ;;  %v380_v27 = vpop.permute.xlu1 %379 }
  0x98   : > { %v397_v28 = vpop.permute.xlu0 %396  ;;  %v402_v29 = vpop.permute.xlu1 %401 }
  0x9d   : > { %v407_v30 = vpop.permute.xlu0 %406  ;;  %v412_v47 = vpop.permute.xlu1 %411 }
  0xfe   : > { %v339_v31 = vpop.f32.mrb[0].mxu0  ;;  %v349_v32 = vpop.f32.mrb[0].mxu1 }
  0xff   : > { %v382_v33 = vmul.f32 %v365_v24, %v339_v31  ;;  %v386_v34 = vmul.f32 %v375_v25, %v349_v32  ;;  %v341_v35 = vpop.f32.mrb[1].mxu0  ;;  %v351_v36 = vpop.f32.mrb[1].mxu1 }
 0x100   : > { %v383_v37 = vmul.f32 %v365_v24, %v341_v35  ;;  %v387_v38 = vmul.f32 %v375_v25, %v351_v36  ;;  %v343_v39 = vpop.f32.mrb[2].mxu0  ;;  %v353_v40 = vpop.f32.mrb[2].mxu1 }
 0x101   : > { %v414_v41 = vadd.f32 %v397_v28, %v382_v33  ;;  %v418_v42 = vadd.f32 %v407_v30, %v386_v34  ;;  %v384_v43 = vmul.f32 %v370_v26, %v343_v39  ;;  %v388_v44 = vmul.f32 %v380_v27, %v353_v40  ;;  %v345_v45 = vpop.f32.mrb[3].mxu0  ;;  %v355_v46 = vpop.f32.mrb[3].mxu1 }
 0x102   : > { %v415_v48 = vadd.f32 %v397_v28, %v383_v37  ;;  %v419_v49 = vadd.f32 %v407_v30, %v387_v38  ;;  %v385_v50 = vmul.f32 %v370_v26, %v345_v45  ;;  %v389_v51 = vmul.f32 %v380_v27, %v355_v46 }
 0x103   : > { %v422_v52 = vmax.f32 %v414_v41, 0.0  ;;  %v426_v53 = vmax.f32 %v418_v42, 0.0  ;;  %v416_v54 = vadd.f32 %v402_v29, %v384_v43  ;;  %v420_v55 = vadd.f32 %v412_v47, %v388_v44 }
 0x104   : > { %v423_v56 = vmax.f32 %v415_v48, 0.0  ;;  %v427_v57 = vmax.f32 %v419_v49, 0.0  ;;  %v417_v58 = vadd.f32 %v402_v29, %v385_v50  ;;  %v421_v59 = vadd.f32 %v412_v47, %v389_v51 }
 0x105   : > { %430 = vst [vmem:[%s215_s21] sm:$0xff] %v422_v52  ;;  %434 = vst [vmem:[%s215_s21 + $0x20] sm:$0xff] %v426_v53  ;;  %v424_v60 = vmax.f32 %v416_v54, 0.0  ;;  %v428_v61 = vmax.f32 %v420_v55, 0.0 }
 0x106   : > { %431 = vst [vmem:[%s215_s21 + $0x8] sm:$0xff] %v423_v56  ;;  %435 = vst [vmem:[%s215_s21 + $0x28] sm:$0xff] %v427_v57  ;;  %v425_v62 = vmax.f32 %v417_v58, 0.0  ;;  %v429_v63 = vmax.f32 %v421_v59, 0.0 }
 0x107   : > { %432 = vst [vmem:[%s215_s21 + $0x10] sm:$0xff] %v424_v60  ;;  %436 = vst [vmem:[%s215_s21 + $0x30] sm:$0xff] %v428_v61 }
 0x108   : > { %433 = vst [vmem:[%s215_s21 + $0x18] sm:$0xff] %v425_v62  ;;  %437 = vst [vmem:[%s215_s21 + $0x38] sm:$0xff] %v429_v63 }
 0x109   : > { %656 = shalt.err (!%p653_p5)
}
 0x10a   : > { %s657_s8 = scalar_lea.hbm %s850_s18, 1024  ;;  %s661_s11 = scalar_lea.hbm %s906_s4, 2048 }
 0x10b   : > { %p658_p6 = scmp.ne.s32.totalorder %s850_s18, %s657_s8  ;;  %p662_p10 = scmp.lt.u32.totalorder %s850_s18, %s906_s4 }
 0x10c   : > { %p663_p11 = scmp.lt.u32.totalorder %s661_s11, %s657_s8  ;;  %p665_p13 = scmp.lt.u32.totalorder %s657_s8, %s850_s18 }
 0x10d   : > { %p659_p7 = pnand %p658_p6, %p793_p4 }
 0x10e   : > { %p664_p12 = por %p663_p11, %p662_p10 }
 0x10f   : > { %p660_p9 = pneg %p659_p7 }
 0x110   : > { %p666_p0 = por %p665_p13, %p664_p12 }
 0x112   : > { %p667_p1 = pnand %p666_p0, %p660_p9 }
 0x114   : > { %670 = shalt.err (!%p667_p1)
}
 0x115   : > { %s726_s14 = smov 256   ;;  %s727_s21 = smov 16  }
 0x116   : > { %568 = dma.vmem_to_hbm [thread:$0]  (%p793_p4), %s852_s22, 1024, %s850_s18, %s856_s29, %s726_s14, %s726_s14, %s727_s21  }
 0x117 PF: > { %p574_p2 = scmp.ge.s32.totalorder %s721_s20, 2  ;;  %s469_s24 = sand.u32 1, %s701_s15  }
 0x118   : > { %s470_s26 = scalar_lea.sflag [#allocation3], %s469_s24 }
 0x119   : > { %p571_p3 = pnand %p574_p2, %p800_p8 }
 0x11b   : > { %696 = dma.done.wait (!%p571_p3), %s470_s26, 1024  }
 0x11c   : > { %698 = vsyncadd (!%p571_p3), %s470_s26, 4294966272  ;;  %s17_s20 = sadd.s32 1, %s721_s20   ;;  %s909_s15 = smov %s705_s16 }
 0x11d   : > { %p14_p5 = scmp.ge.s32.totalorder %s17_s20, 4   ;;  %s910_s16 = smov %s709_s17 }
 0x11e   : > { %s911_s17 = smov %s806_s28  ;;  %s912_s18 = smov %s717_s19 }
 0x11f   : > { %s913_s19 = smov %s915_s23  ;;  %16 = sbr.rel (!%p14_p5) target bundleno = 4 (0x4), region = 71 }
 0x126   :  { %475 = vsyncpa [#allocation3], 1 }
 0x127   :  { %477 = vsyncpa [#allocation3 + $0x1], 1 }

</bundles_post_ra>
